<compile_context>
chip_gen: v7x
topology: tpu7x:2x2x1
jax: 0.10.0
libtpu: 0.0.40
codegen_flags: <defaults>
</compile_context>

<pallas_src>
import functools

import numpy as np
import jax
import jax.numpy as jnp
from jax.experimental import pallas as pl
from jax.experimental.pallas import tpu as pltpu


def _round_up(x, m):
    return ((x + m - 1) // m) * m


# ---------------------------------------------------------------------------
# Fused post-top_k kernel.
#   feat slab : (B, R, S_pad) f32, feature-major (lane axis = selection index)
#   wh        : (B, 2) f32 in SMEM — per-image (img_w, img_h)
#   out slab  : (B, R, S_pad) f32, same row layout, transformed
# ---------------------------------------------------------------------------
def _post_select_kernel(feat_ref, wh_ref, out_ref, *, nbp_pad):
    b = pl.program_id(0)
    w = wh_ref[b, 0]                       # scalar reads from SMEM
    h = wh_ref[b, 1]
    s_pad = feat_ref.shape[2]

    # row 0: scores = sigmoid(selected logits)
    out_ref[0, 0:1, :] = jax.nn.sigmoid(feat_ref[0, 0:1, :])

    # rows 1..4: cxcywh -> xyxy, scaled by (W, H, W, H). Direct row-slice stores,
    # no sublane concatenate.
    cx = feat_ref[0, 1:2, :]
    cy = feat_ref[0, 2:3, :]
    hw = 0.5 * feat_ref[0, 3:4, :]
    hh = 0.5 * feat_ref[0, 4:5, :]
    out_ref[0, 1:2, :] = (cx - hw) * w
    out_ref[0, 2:3, :] = (cy - hh) * h
    out_ref[0, 3:4, :] = (cx + hw) * w
    out_ref[0, 4:5, :] = (cy + hh) * h

    # rows 5..7: padding rows — keep the output block fully defined (cheap).
    out_ref[0, 5:8, :] = jnp.zeros((3, s_pad), out_ref.dtype)

    # keypoint planes: 8-aligned, full-block scalar-broadcast multiplies.
    kx0 = 8
    ky0 = 8 + nbp_pad
    out_ref[0, kx0:ky0, :] = feat_ref[0, kx0:ky0, :] * w
    out_ref[0, ky0:ky0 + nbp_pad, :] = feat_ref[0, ky0:ky0 + nbp_pad, :] * h


def post_select_pallas(slab, wh, *, nbp_pad):
    B, R, S_pad = slab.shape
    kernel = functools.partial(_post_select_kernel, nbp_pad=nbp_pad)
    return pl.pallas_call(
        kernel,
        out_shape=jax.ShapeDtypeStruct((B, R, S_pad), jnp.float32),
        grid=(B,),
        in_specs=[pl.BlockSpec((1, R, S_pad), lambda b: (b, 0, 0)),
                  pl.BlockSpec(memory_space=pltpu.MemorySpace.SMEM)],
        out_specs=pl.BlockSpec((1, R, S_pad), lambda b: (b, 0, 0)),
        compiler_params=pltpu.CompilerParams(dimension_semantics=("parallel",)),
    )(slab, wh)


# ---------------------------------------------------------------------------
# Forward pass (plain-JAX top_k / gather / layout glue + ONE fused Pallas kernel)
# ---------------------------------------------------------------------------
@functools.partial(jax.jit, static_argnames=("num_select", "num_body_points"))
def _postprocess_core(out_logits, out_bbox, out_keypoints, target_sizes,
                      num_select, num_body_points):
    B, Q, C = out_logits.shape
    nbp = num_body_points
    S = num_select
    S_pad = _round_up(S, 128)          # lane-dense selection axis
    nbp_pad = _round_up(nbp, 8)        # 8-aligned sublane row blocks
    R = 8 + 2 * nbp_pad

    # --- top-k directly on raw logits (sigmoid is monotone => same selection) ---
    flat = out_logits.reshape(B, Q * C)
    topk_values, topk_indexes = jax.lax.top_k(flat, S)
    topk_boxes = (topk_indexes // C).astype(jnp.int32)
    labels = (topk_indexes % C).astype(jnp.int32)

    # --- gather ONLY the S selected rows, native dtype; cast AFTER the gather ---
    idx4 = jnp.broadcast_to(topk_boxes[:, :, None], (B, S, 4))
    boxes_sel = jnp.take_along_axis(out_bbox, idx4, axis=1).astype(jnp.float32)
    idxk = jnp.broadcast_to(topk_boxes[:, :, None], (B, S, 3 * nbp))
    kps_sel = jnp.take_along_axis(out_keypoints[..., :3 * nbp], idxk,
                                  axis=1).astype(jnp.float32)

    # --- layout plumbing: one feature-major slab (lane axis = selection) ---
    boxes_t = jnp.transpose(boxes_sel, (0, 2, 1))                     # (B, 4, S)
    z = kps_sel[..., :2 * nbp].reshape(B, S, nbp, 2)                  # (x, y) pairs
    kpx_t = jnp.transpose(z[..., 0], (0, 2, 1))                       # (B, nbp, S)
    kpy_t = jnp.transpose(z[..., 1], (0, 2, 1))                       # (B, nbp, S)
    kpv_t = jnp.transpose(kps_sel[..., 2 * nbp:], (0, 2, 1))          # (B, nbp, S)

    slab = jnp.zeros((B, R, S_pad), jnp.float32)
    slab = slab.at[:, 0, :S].set(topk_values.astype(jnp.float32))
    slab = slab.at[:, 1:5, :S].set(boxes_t)
    slab = slab.at[:, 8:8 + nbp, :S].set(kpx_t)
    slab = slab.at[:, 8 + nbp_pad:8 + nbp_pad + nbp, :S].set(kpy_t)

    img_h = target_sizes[:, 0]
    img_w = target_sizes[:, 1]
    wh = jnp.stack([img_w, img_h], axis=1).astype(jnp.float32)        # (B, 2) SMEM

    # --- single fused Pallas kernel ---
    out = post_select_pallas(slab, wh, nbp_pad=nbp_pad)

    scores = out[:, 0, :S]
    boxes = jnp.transpose(out[:, 1:5, :S], (0, 2, 1))                 # (B, S, 4)
    kpx_o = out[:, 8:8 + nbp, :S]
    kpy_o = out[:, 8 + nbp_pad:8 + nbp_pad + nbp, :S]
    # keypoints_res[..., 0::3]=x*W, [..., 1::3]=y*H, [..., 2::3]=visibility
    kres = jnp.stack([kpx_o, kpy_o, kpv_t], axis=-1)                  # (B, nbp, S, 3)
    keypoints_res = jnp.transpose(kres, (0, 2, 1, 3)).reshape(B, S, 3 * nbp)

    return scores, labels, boxes, keypoints_res


def postprocess_aios(outputs, target_sizes, num_select=100, nms_iou_threshold=-1,
                     num_body_points=17, not_to_xyxy=False, test=False):
    out_logits = outputs['pred_logits']
    out_bbox = outputs['pred_boxes']
    out_keypoints = outputs['pred_keypoints']
    assert out_logits.shape[0] == target_sizes.shape[0]
    assert target_sizes.shape[1] == 2
    if not_to_xyxy or test:
        # TODO(synk): not_to_xyxy / test branches of the reference forward are not implemented.
        raise NotImplementedError("not_to_xyxy / test branches not implemented")
    if nms_iou_threshold > 0:
        # Matches the reference module, which raises NotImplementedError here.
        raise NotImplementedError

    scores, labels, boxes, keypoints_res = _postprocess_core(
        out_logits, out_bbox, out_keypoints, target_sizes,
        num_select=num_select, num_body_points=num_body_points)

    return [{'scores': scores[b], 'labels': labels[b], 'boxes': boxes[b],
             'keypoints': keypoints_res[b]}
            for b in range(out_logits.shape[0])]


# ---------------------------------------------------------------------------
# Plain-JAX reference (mirrors the PyTorch module) for a numerical sanity check
# ---------------------------------------------------------------------------
def _reference(out_logits, out_bbox, out_keypoints, target_sizes, S, nbp):
    B, Q, C = out_logits.shape
    prob = jax.nn.sigmoid(out_logits.astype(jnp.float32)).reshape(B, -1)
    tv, ti = jax.lax.top_k(prob, S)
    scores = tv
    tb = ti // C
    labels = (ti % C).astype(jnp.int32)
    bb = out_bbox.astype(jnp.float32)
    cx, cy, w_, h_ = bb[..., 0], bb[..., 1], bb[..., 2], bb[..., 3]
    xyxy = jnp.stack([cx - 0.5 * w_, cy - 0.5 * h_,
                      cx + 0.5 * w_, cy + 0.5 * h_], axis=-1)
    boxes = jnp.take_along_axis(xyxy, jnp.broadcast_to(tb[:, :, None], (B, S, 4)),
                                axis=1)
    img_h, img_w = target_sizes[:, 0], target_sizes[:, 1]
    scale = jnp.stack([img_w, img_h, img_w, img_h], axis=1)
    boxes = boxes * scale[:, None, :]
    kps = jnp.take_along_axis(out_keypoints.astype(jnp.float32),
                              jnp.broadcast_to(tb[:, :, None], (B, S, 3 * nbp)),
                              axis=1)
    Z = kps[..., :2 * nbp]
    V = kps[..., 2 * nbp:]
    zscale = jnp.tile(jnp.stack([img_w, img_h], axis=1), (1, nbp))
    Z = Z * zscale[:, None, :]
    kres = jnp.zeros_like(kps)
    kres = kres.at[..., 0::3].set(Z[..., 0::2])
    kres = kres.at[..., 1::3].set(Z[..., 1::2])
    kres = kres.at[..., 2::3].set(V)
    return scores, labels, boxes, kres


if __name__ == "__main__":
    B, Q, C = 2, 32, 2         # batch, queries, classes
    S = 8                      # num_select
    NBP = 17                   # num_body_points -> keypoint dim 51

    key = jax.random.PRNGKey(0)
    k0, k1, k2 = jax.random.split(key, 3)
    outputs = {
        'pred_logits': jax.random.normal(k0, (B, Q, C), jnp.float32),
        'pred_boxes': jax.nn.sigmoid(jax.random.normal(k1, (B, Q, 4), jnp.float32)),
        'pred_keypoints': jax.nn.sigmoid(
            jax.random.normal(k2, (B, Q, 3 * NBP), jnp.float32)),
    }
    target_sizes = jnp.array([[512.0, 640.0], [480.0, 360.0]], jnp.float32)  # (h, w)

    results = postprocess_aios(outputs, target_sizes, num_select=S,
                               num_body_points=NBP)
    jax.block_until_ready(results)

    # sanity check against the plain-JAX reference of the PyTorch module
    sc_r, lb_r, bx_r, kp_r = _reference(outputs['pred_logits'],
                                        outputs['pred_boxes'],
                                        outputs['pred_keypoints'],
                                        target_sizes, S, NBP)
    scores = jnp.stack([r['scores'] for r in results])
    labels = jnp.stack([r['labels'] for r in results])
    boxes = jnp.stack([r['boxes'] for r in results])
    kpts = jnp.stack([r['keypoints'] for r in results])
    np.testing.assert_allclose(np.asarray(scores), np.asarray(sc_r), rtol=1e-4, atol=1e-4)
    np.testing.assert_array_equal(np.asarray(labels), np.asarray(lb_r))
    np.testing.assert_allclose(np.asarray(boxes), np.asarray(bx_r), rtol=1e-4, atol=1e-3)
    np.testing.assert_allclose(np.asarray(kpts), np.asarray(kp_r), rtol=1e-4, atol=1e-3)

    print("KERNEL_OK")
</pallas_src>

<mosaic_0001>
module attributes {stable_mosaic.version = 11 : i64} {
  func.func @_post_select_kernel(%arg0: i32, %arg1: memref<1x56x128xf32, #tpu.memory_space<vmem>>, %arg2: memref<2x2xf32, #tpu.memory_space<smem>>, %arg3: memref<1x56x128xf32, #tpu.memory_space<vmem>>) attributes {dimension_semantics = [#tpu.dimension_semantics<parallel>], iteration_bounds = array<i64: 2>, scalar_prefetch = 0 : i64, scratch_operands = 0 : i64, tpu.core_type = #tpu.core_type<tc>, window_params = [{transform_indices = @transform_0, window_bounds = array<i64: 1, 56, 128>}, {transform_indices = @transform_1, window_bounds = array<i64: 2, 2>}, {transform_indices = @transform_2, window_bounds = array<i64: 1, 56, 128>}]} {
    %0 = arith.index_cast %arg0 : i32 to index
    %c0 = arith.constant 0 : index
    %1 = memref.load %arg2[%0, %c0] : memref<2x2xf32, #tpu.memory_space<smem>>
    %2 = arith.index_cast %arg0 : i32 to index
    %c1 = arith.constant 1 : index
    %3 = memref.load %arg2[%2, %c1] : memref<2x2xf32, #tpu.memory_space<smem>>
    %c0_0 = arith.constant 0 : index
    %c0_1 = arith.constant 0 : index
    %c0_2 = arith.constant 0 : index
    %4 = vector.load %arg1[%c0_0, %c0_1, %c0_2] : memref<1x56x128xf32, #tpu.memory_space<vmem>>, vector<1x1x128xf32>
    %5 = vector.shape_cast %4 : vector<1x1x128xf32> to vector<1x128xf32>
    %6 = arith.negf %5 : vector<1x128xf32>
    %7 = math.exp %6 : vector<1x128xf32>
    %cst = arith.constant 1.000000e+00 : f32
    %8 = vector.broadcast %cst : f32 to vector<1x128xf32>
    %9 = arith.addf %8, %7 : vector<1x128xf32>
    %10 = arith.divf %8, %9 : vector<1x128xf32>
    %c0_3 = arith.constant 0 : index
    %c0_4 = arith.constant 0 : index
    %c0_5 = arith.constant 0 : index
    %11 = vector.load %arg3[%c0_3, %c0_4, %c0_5] : memref<1x56x128xf32, #tpu.memory_space<vmem>>, vector<1x1x128xf32>
    %12 = vector.shape_cast %11 : vector<1x1x128xf32> to vector<1x128xf32>
    %13 = vector.shape_cast %10 : vector<1x128xf32> to vector<1x1x128xf32>
    tpu.vector_store %arg3[%c0_3, %c0_4, %c0_5], %13 {strides = array<i32>} : memref<1x56x128xf32, #tpu.memory_space<vmem>>, vector<1x1x128xf32>,
    %c0_6 = arith.constant 0 : index
    %c1_7 = arith.constant 1 : index
    %c0_8 = arith.constant 0 : index
    %14 = vector.load %arg1[%c0_6, %c1_7, %c0_8] : memref<1x56x128xf32, #tpu.memory_space<vmem>>, vector<1x1x128xf32>
    %15 = vector.shape_cast %14 : vector<1x1x128xf32> to vector<1x128xf32>
    %c0_9 = arith.constant 0 : index
    %c2 = arith.constant 2 : index
    %c0_10 = arith.constant 0 : index
    %16 = vector.load %arg1[%c0_9, %c2, %c0_10] : memref<1x56x128xf32, #tpu.memory_space<vmem>>, vector<1x1x128xf32>
    %17 = vector.shape_cast %16 : vector<1x1x128xf32> to vector<1x128xf32>
    %c0_11 = arith.constant 0 : index
    %c3 = arith.constant 3 : index
    %c0_12 = arith.constant 0 : index
    %18 = vector.load %arg1[%c0_11, %c3, %c0_12] : memref<1x56x128xf32, #tpu.memory_space<vmem>>, vector<1x1x128xf32>
    %19 = vector.shape_cast %18 : vector<1x1x128xf32> to vector<1x128xf32>
    %cst_13 = arith.constant 5.000000e-01 : f32
    %20 = vector.broadcast %cst_13 : f32 to vector<1x128xf32>
    %21 = arith.mulf %20, %19 : vector<1x128xf32>
    %c0_14 = arith.constant 0 : index
    %c4 = arith.constant 4 : index
    %c0_15 = arith.constant 0 : index
    %22 = vector.load %arg1[%c0_14, %c4, %c0_15] : memref<1x56x128xf32, #tpu.memory_space<vmem>>, vector<1x1x128xf32>
    %23 = vector.shape_cast %22 : vector<1x1x128xf32> to vector<1x128xf32>
    %cst_16 = arith.constant 5.000000e-01 : f32
    %24 = vector.broadcast %cst_16 : f32 to vector<1x128xf32>
    %25 = arith.mulf %24, %23 : vector<1x128xf32>
    %26 = arith.subf %15, %21 : vector<1x128xf32>
    %27 = vector.broadcast %1 : f32 to vector<1x128xf32>
    %28 = arith.mulf %26, %27 : vector<1x128xf32>
    %c0_17 = arith.constant 0 : index
    %c1_18 = arith.constant 1 : index
    %c0_19 = arith.constant 0 : index
    %29 = vector.load %arg3[%c0_17, %c1_18, %c0_19] : memref<1x56x128xf32, #tpu.memory_space<vmem>>, vector<1x1x128xf32>
    %30 = vector.shape_cast %29 : vector<1x1x128xf32> to vector<1x128xf32>
    %31 = vector.shape_cast %28 : vector<1x128xf32> to vector<1x1x128xf32>
    tpu.vector_store %arg3[%c0_17, %c1_18, %c0_19], %31 {strides = array<i32>} : memref<1x56x128xf32, #tpu.memory_space<vmem>>, vector<1x1x128xf32>,
    %32 = arith.subf %17, %25 : vector<1x128xf32>
    %33 = vector.broadcast %3 : f32 to vector<1x128xf32>
    %34 = arith.mulf %32, %33 : vector<1x128xf32>
    %c0_20 = arith.constant 0 : index
    %c2_21 = arith.constant 2 : index
    %c0_22 = arith.constant 0 : index
    %35 = vector.load %arg3[%c0_20, %c2_21, %c0_22] : memref<1x56x128xf32, #tpu.memory_space<vmem>>, vector<1x1x128xf32>
    %36 = vector.shape_cast %35 : vector<1x1x128xf32> to vector<1x128xf32>
    %37 = vector.shape_cast %34 : vector<1x128xf32> to vector<1x1x128xf32>
    tpu.vector_store %arg3[%c0_20, %c2_21, %c0_22], %37 {strides = array<i32>} : memref<1x56x128xf32, #tpu.memory_space<vmem>>, vector<1x1x128xf32>,
    %38 = arith.addf %15, %21 : vector<1x128xf32>
    %39 = vector.broadcast %1 : f32 to vector<1x128xf32>
    %40 = arith.mulf %38, %39 : vector<1x128xf32>
    %c0_23 = arith.constant 0 : index
    %c3_24 = arith.constant 3 : index
    %c0_25 = arith.constant 0 : index
    %41 = vector.load %arg3[%c0_23, %c3_24, %c0_25] : memref<1x56x128xf32, #tpu.memory_space<vmem>>, vector<1x1x128xf32>
    %42 = vector.shape_cast %41 : vector<1x1x128xf32> to vector<1x128xf32>
    %43 = vector.shape_cast %40 : vector<1x128xf32> to vector<1x1x128xf32>
    tpu.vector_store %arg3[%c0_23, %c3_24, %c0_25], %43 {strides = array<i32>} : memref<1x56x128xf32, #tpu.memory_space<vmem>>, vector<1x1x128xf32>,
    %44 = arith.addf %17, %25 : vector<1x128xf32>
    %45 = vector.broadcast %3 : f32 to vector<1x128xf32>
    %46 = arith.mulf %44, %45 : vector<1x128xf32>
    %c0_26 = arith.constant 0 : index
    %c4_27 = arith.constant 4 : index
    %c0_28 = arith.constant 0 : index
    %47 = vector.load %arg3[%c0_26, %c4_27, %c0_28] : memref<1x56x128xf32, #tpu.memory_space<vmem>>, vector<1x1x128xf32>
    %48 = vector.shape_cast %47 : vector<1x1x128xf32> to vector<1x128xf32>
    %49 = vector.shape_cast %46 : vector<1x128xf32> to vector<1x1x128xf32>
    tpu.vector_store %arg3[%c0_26, %c4_27, %c0_28], %49 {strides = array<i32>} : memref<1x56x128xf32, #tpu.memory_space<vmem>>, vector<1x1x128xf32>,
    %cst_29 = arith.constant 0.000000e+00 : f32
    %50 = vector.broadcast %cst_29 : f32 to vector<3x128xf32>
    %c0_30 = arith.constant 0 : index
    %c5 = arith.constant 5 : index
    %c0_31 = arith.constant 0 : index
    %51 = vector.load %arg3[%c0_30, %c5, %c0_31] : memref<1x56x128xf32, #tpu.memory_space<vmem>>, vector<1x3x128xf32>
    %52 = vector.shape_cast %51 : vector<1x3x128xf32> to vector<3x128xf32>
    %53 = vector.shape_cast %50 : vector<3x128xf32> to vector<1x3x128xf32>
    tpu.vector_store %arg3[%c0_30, %c5, %c0_31], %53 {strides = array<i32>} : memref<1x56x128xf32, #tpu.memory_space<vmem>>, vector<1x3x128xf32>,
    %c0_32 = arith.constant 0 : index
    %c8 = arith.constant 8 : index
    %c0_33 = arith.constant 0 : index
    %54 = vector.load %arg1[%c0_32, %c8, %c0_33] : memref<1x56x128xf32, #tpu.memory_space<vmem>>, vector<1x24x128xf32>
    %55 = vector.shape_cast %54 : vector<1x24x128xf32> to vector<24x128xf32>
    %56 = vector.broadcast %1 : f32 to vector<24x128xf32>
    %57 = arith.mulf %55, %56 : vector<24x128xf32>
    %c0_34 = arith.constant 0 : index
    %c8_35 = arith.constant 8 : index
    %c0_36 = arith.constant 0 : index
    %58 = vector.load %arg3[%c0_34, %c8_35, %c0_36] : memref<1x56x128xf32, #tpu.memory_space<vmem>>, vector<1x24x128xf32>
    %59 = vector.shape_cast %58 : vector<1x24x128xf32> to vector<24x128xf32>
    %60 = vector.shape_cast %57 : vector<24x128xf32> to vector<1x24x128xf32>
    tpu.vector_store %arg3[%c0_34, %c8_35, %c0_36], %60 {strides = array<i32>} : memref<1x56x128xf32, #tpu.memory_space<vmem>>, vector<1x24x128xf32>,
    %c0_37 = arith.constant 0 : index
    %c32 = arith.constant 32 : index
    %c0_38 = arith.constant 0 : index
    %61 = vector.load %arg1[%c0_37, %c32, %c0_38] : memref<1x56x128xf32, #tpu.memory_space<vmem>>, vector<1x24x128xf32>
    %62 = vector.shape_cast %61 : vector<1x24x128xf32> to vector<24x128xf32>
    %63 = vector.broadcast %3 : f32 to vector<24x128xf32>
    %64 = arith.mulf %62, %63 : vector<24x128xf32>
    %c0_39 = arith.constant 0 : index
    %c32_40 = arith.constant 32 : index
    %c0_41 = arith.constant 0 : index
    %65 = vector.load %arg3[%c0_39, %c32_40, %c0_41] : memref<1x56x128xf32, #tpu.memory_space<vmem>>, vector<1x24x128xf32>
    %66 = vector.shape_cast %65 : vector<1x24x128xf32> to vector<24x128xf32>
    %67 = vector.shape_cast %64 : vector<24x128xf32> to vector<1x24x128xf32>
    tpu.vector_store %arg3[%c0_39, %c32_40, %c0_41], %67 {strides = array<i32>} : memref<1x56x128xf32, #tpu.memory_space<vmem>>, vector<1x24x128xf32>,
    return
  }
  func.func @transform_0(%arg0: i32) -> (i32, i32, i32) {
    %c0_i32 = arith.constant 0 : i32
    %c0_i32_0 = arith.constant 0 : i32
    %c0_i32_1 = arith.constant 0 : i32
    return %arg0, %c0_i32, %c0_i32_0 : i32, i32, i32
  }
  func.func @transform_1(%arg0: i32) -> (i32, i32) {
    %c0_i32 = arith.constant 0 : i32
    %c0_i32_0 = arith.constant 0 : i32
    %c0_i32_1 = arith.constant 0 : i32
    return %c0_i32, %c0_i32_0 : i32, i32
  }
  func.func @transform_2(%arg0: i32) -> (i32, i32, i32) {
    %c0_i32 = arith.constant 0 : i32
    %c0_i32_0 = arith.constant 0 : i32
    %c0_i32_1 = arith.constant 0 : i32
    return %arg0, %c0_i32, %c0_i32_0 : i32, i32, i32
  }
}

</mosaic_0001>

<bundles_post_ra>
// kernel: _postprocess_core.1
= control target key start
LH: loop header
LB: loop body
LE: loop exit
PB: predicated region body
PF: predicated region fallthrough
CT: control target
= control target key end

     0   :  { %7 = vsyncpa [#allocation3], 0  ;;  %s358_s9 = smov 0   ;;  %s403_s0 = inlined_call_operand.vmem [shape: f32[2,56,128], index: 0, kind: input, shape index: {}]   ;;  %s404_s1 = inlined_call_operand.vmem [shape: f32[2,2], index: 1, kind: input, shape index: {}]   ;;  %s405_s2 = inlined_call_operand.vmem [shape: f32[2,56,128], index: 2, kind: output, shape index: {}]  }
   0x1 LB: > { %s276_s10 = sadd.s32 4294967295, %s339_s9   ;;  %p278_p0 = scmp.ge.s32.totalorder %s339_s9, 1  ;;  %s339_s9 = sphi %s358_s9, %s13_s9  }
   0x2   : > { %p91_p1 = scmp.lt.s32.totalorder %s339_s9, 3  ;;  %s104_s13 = sshll.u32 %s404_s1, 4  ;;  %s105_s13 = int_to_ptr.vmem [resolvable:$true] %s104_s13 }
   0x3   : > { %p298_p3 = scmp.eq.s32.totalorder %s276_s10, 0  ;;  %s314_s15 = scalar_lea.vmem %s105_s13, 32 }
   0x4   : > { %p369_p2 = pnand %p278_p0, %p91_p1  ;;  %p315_p6 = scmp.ne.s32.totalorder %s105_s13, %s314_s15 }
   0x5   : > { %p322_p10 = scmp.lt.s32.totalorder %s105_s13, %s105_s13  ;;  %p323_p11 = scmp.lt.s32.totalorder %s314_s15, %s314_s15 }
   0x6   : > { %p294_p4 = pneg %p369_p2 }
   0x7   : > { %p324_p12 = por %p323_p11, %p322_p10 }
   0x8   : > { %p295_p5 = pnand %p298_p3, %p294_p4 }
   0xa   : > { %p316_p7 = pneg %p295_p5 }
   0xc   : > { %p317_p8 = pnand %p316_p7, %p315_p6 }
   0xe   : > { %p318_p9 = pneg %p317_p8 }
  0x10   : > { %p325_p13 = pnand %p324_p12, %p318_p9 }
  0x12   : > { %328 = shalt.err (!%p325_p13)
}
  0x13   : > { %s341_s16 = smov [#allocation2]   ;;  %125 = sbr.rel (%p369_p2) target bundleno = 63 (0x3f), region = 28 }
  0x14   : > { %297 = dma.vmem_to_smem (!%p295_p5), %s105_s13, 32, %s341_s16, [#allocation3]  }
  0x1a   : > { %334 = dma.done.wait (%p298_p3), [#allocation3], 32  }
  0x1b   : > { %336 = vsyncadd (%p298_p3), [#allocation3], 4294967264 }
  0x1c   : > { %131 = sfence }
  0x1d   : > { %p148_p0 = scmp.lt.s32.totalorder %s276_s10, 1  ;;  %s285_s17 = sshll.u32 %s276_s10, 7  ;;  %v342_v4 = vmov 0.0  }
  0x1e   : > { %s159_s18 = sld [smem:[#allocation2 + %s285_s17]]  ;;  %s160_s19 = sadd.s32 1, %s285_s17 }
  0x1f   : > { %s408_s10 = smov (!%p148_p0, %s276_s10), 1  ;;  %s161_s20 = sld [smem:[#allocation2 + %s160_s19]] }
  0x20   : > { %s289_s21 = smul.u32 56, %s408_s10 }
  0x22   : > { %s152_s24 = scalar_lea.vmem %s403_s0, %s289_s21  ;;  %s386_s27 = scalar_lea.vmem %s405_s2, %s289_s21 }
  0x23   : > { %v162_v0 = vld [vmem:[%s152_s24] sm:$0x1]  ;;  %v170_v1 = vld [vmem:[%s152_s24 + $0x1] sm:$0x1]  ;;  %v172_v2 = vld [vmem:[%s152_s24 + $0x3] sm:$0x1] }
  0x24   : > { %v177_v3 = vstv %s159_s18  ;;  %190 = vst [vmem:[%s386_s27 + $0x5] sm:$0x7] %v342_v4  ;;  %v286_v5 = vmul.f32 -1.442695, %v162_v0  ;;  %v173_v6 = vmul.f32 0.5, %v172_v2  ;;  %v191_v8 = vld [vmem:[%s152_s24 + $0x8] sm:$0xff] }
  0x25   : > { %v171_v7 = vld [vmem:[%s152_s24 + $0x2] sm:$0x1]  ;;  %v174_v9 = vld [vmem:[%s152_s24 + $0x4] sm:$0x1]  ;;  %v181_v10 = vstv %s161_s20  ;;  %v194_v11 = vmul.f32 %v191_v8, %v177_v3  ;;  %v192_v12 = vld [vmem:[%s152_s24 + $0x10] sm:$0xff] }
  0x26   : > { %v193_v13 = vld [vmem:[%s152_s24 + $0x18] sm:$0xff]  ;;  %310 = vpow2.f32 %v286_v5  ;;  %v176_v14 = vsub.f32 %v170_v1, %v173_v6  ;;  %v175_v15 = vmul.f32 0.5, %v174_v9  ;;  %v184_v16 = vadd.f32 %v173_v6, %v170_v1  ;;  %v200_v17 = vld [vmem:[%s152_s24 + $0x20] sm:$0xff]  ;;  %v201_v18 = vld [vmem:[%s152_s24 + $0x28] sm:$0xff] }
  0x27   : > { %v202_v19 = vld [vmem:[%s152_s24 + $0x30] sm:$0xff]  ;;  %197 = vst [vmem:[%s386_s27 + $0x8] sm:$0xff] %v194_v11  ;;  %v195_v20 = vmul.f32 %v192_v12, %v177_v3  ;;  %v196_v21 = vmul.f32 %v193_v13, %v177_v3  ;;  %v203_v22 = vmul.f32 %v200_v17, %v181_v10  ;;  %v204_v23 = vmul.f32 %v201_v18, %v181_v10 }
  0x28   : > { %v178_v24 = vmul.f32 %v177_v3, %v176_v14  ;;  %v180_v25 = vsub.f32 %v171_v7, %v175_v15  ;;  %v185_v26 = vmul.f32 %v184_v16, %v177_v3  ;;  %v187_v27 = vadd.f32 %v175_v15, %v171_v7 }
  0x29   : > { %198 = vst [vmem:[%s386_s27 + $0x10] sm:$0xff] %v195_v20  ;;  %199 = vst [vmem:[%s386_s27 + $0x18] sm:$0xff] %v196_v21  ;;  %v205_v28 = vmul.f32 %v202_v19, %v181_v10 }
  0x2a   : > { %206 = vst [vmem:[%s386_s27 + $0x20] sm:$0xff] %v203_v22  ;;  %207 = vst [vmem:[%s386_s27 + $0x28] sm:$0xff] %v204_v23  ;;  %v182_v29 = vmul.f32 %v181_v10, %v180_v25  ;;  %v188_v30 = vmul.f32 %v187_v27, %v181_v10 }
  0x2b   : > { %179 = vst [vmem:[%s386_s27 + $0x1] sm:$0x1] %v178_v24  ;;  %186 = vst [vmem:[%s386_s27 + $0x3] sm:$0x1] %v185_v26 }
  0x2c   : > { %208 = vst [vmem:[%s386_s27 + $0x30] sm:$0xff] %v205_v28  ;;  %183 = vst [vmem:[%s386_s27 + $0x2] sm:$0x1] %v182_v29 }
  0x2d   : > { %189 = vst [vmem:[%s386_s27 + $0x4] sm:$0x1] %v188_v30 }
  0x30   : > { %v311_v31 = vpop.eup %310 }
  0x31   : > { %v166_v32 = vadd.f32 1.0, %v311_v31 }
  0x33   : > { %312 = vrcp.f32 %v166_v32 }
  0x3d   : > { %v313_v33 = vpop.eup %312 }
  0x3e   : > { %169 = vst [vmem:[%s386_s27] sm:$0x1] %v313_v33 }
  0x3f PF: > { %s13_s9 = sadd.s32 1, %s339_s9  }
  0x40   : > { %p10_p1 = scmp.ge.s32.totalorder %s13_s9, 4  }
  0x42   :  { %12 = sbr.rel (!%p10_p1) target bundleno = 1 (0x1), region = 63 }
  0x49   :  { %230 = vsyncpa [#allocation3], 1 }
  0x4a   :  { %232 = vsyncpa [#allocation3 + $0x1], 1 }

</bundles_post_ra>
